<compile_context>
chip_gen: v5e
topology: v5e:2x2
jax: 0.10.0
libtpu: 0.0.40
codegen_flags: <defaults>
</compile_context>

<pallas_src>
import jax
import jax.numpy as jnp
import numpy as np
from jax import lax
from jax.experimental import pallas as pl
from jax.experimental.pallas import tpu as pltpu


# ----------------------------------------------------------------------------
# Fused LSTM-recurrence + MLP-head kernel (single invocation, no grid).
#
# Inputs (all whole-array resident in VMEM):
#   gx_ref  : (T*B, 4H) f32   pre-projected gate inputs x@W_ih^T + b_ih + b_hh,
#                             time-major rows (row = t*B + b), gate order [i|f|g|o].
#   whh_ref : (H, 4H)   bf16  fused recurrent weights (= W_hh^T), so
#                             gates = h @ whh_ref.
#   h0_ref, c0_ref : (B, H) f32   initial hidden / cell state.
#   w1_ref (H, H2) bf16, b1_ref (1, H2) f32, w2_ref (H2, O) bf16, b2_ref (1, O) f32.
# Outputs:
#   out_ref : (B, T, O) f32   fc2(relu(fc1(h_t))) written per step at [:, t, :].
#   hn_ref, cn_ref : (B, H)   final hidden / cell state.
# ----------------------------------------------------------------------------
def lstm_mlp_kernel(gx_ref, whh_ref, h0_ref, c0_ref,
                    w1_ref, b1_ref, w2_ref, b2_ref,
                    out_ref, hn_ref, cn_ref):
    B, H = h0_ref.shape
    T = out_ref.shape[1]

    # Load weights once (kept bf16 for single-pass MXU issues).
    whh = whh_ref[...]            # (H, 4H)
    w1 = w1_ref[...]              # (H, H2)
    b1 = b1_ref[...]              # (1, H2)
    w2 = w2_ref[...]              # (H2, O)
    b2 = b2_ref[...]              # (1, O)

    h = h0_ref[...].astype(jnp.float32)
    c = c0_ref[...].astype(jnp.float32)

    # Fully unrolled serial recurrence (T is small & static).
    # TODO(synk): switch to lax.fori_loop(+scratch slab) if T grows to hundreds.
    for t in range(T):
        gx_t = gx_ref[pl.ds(t * B, B), :]                       # (B, 4H) f32
        # ONE fused recurrent matmul per step (bf16 operands, f32 accumulate).
        gates = gx_t + jnp.dot(h.astype(jnp.bfloat16), whh,
                               preferred_element_type=jnp.float32)

        # Two full-width EUP pushes instead of four quarter-width ones.
        sig = jax.nn.sigmoid(gates)                             # (B, 4H)
        tnh = jnp.tanh(gates)                                   # (B, 4H)
        i_g = sig[:, 0 * H:1 * H]
        f_g = sig[:, 1 * H:2 * H]
        g_g = tnh[:, 2 * H:3 * H]
        o_g = sig[:, 3 * H:4 * H]

        c = f_g * c + i_g * g_g
        h = o_g * jnp.tanh(c)

        # Fused MLP head on this step's hidden state (fills MXU idle cycles).
        hid = jnp.dot(h.astype(jnp.bfloat16), w1,
                      preferred_element_type=jnp.float32) + b1
        hid = jnp.maximum(hid, 0.0)
        out_t = jnp.dot(hid.astype(jnp.bfloat16), w2,
                        preferred_element_type=jnp.float32) + b2
        out_ref[:, t, :] = out_t.astype(out_ref.dtype)          # rows b*T + t of flat output

    hn_ref[...] = h.astype(hn_ref.dtype)
    cn_ref[...] = c.astype(cn_ref.dtype)


# ----------------------------------------------------------------------------
# Wrapper
# ----------------------------------------------------------------------------
def char_lstm_forward(tokens, hidden, params):
    """tokens: (B, T) int32; hidden: (h0, c0) each (1, B, H).

    Returns (output, (h_n, c_n)) matching torch semantics:
      output: (B*T, output_size), h_n/c_n: (1, B, H).
    """
    h0, c0 = hidden
    B, T = tokens.shape
    H = params["w_hh"].shape[1]
    H2 = params["fc1_w"].shape[0]
    O = params["fc2_w"].shape[0]

    # Fold the input projection and both biases into the embedding table:
    #   proj_table[v] = embedding[v] @ W_ih^T + (b_ih + b_hh)        -> (V, 4H)
    proj_table = (params["embedding"] @ params["w_ih"].T
                  + (params["b_ih"] + params["b_hh"]))
    gx = jnp.take(proj_table, tokens, axis=0)                        # (B, T, 4H)
    # Lane-dense time-major slab: (T*B, 4H), row = t*B + b.
    gx = jnp.transpose(gx, (1, 0, 2)).reshape(T * B, 4 * H)

    # Fused recurrent weights (H, 4H) = W_hh^T, bf16 for single-pass MXU issues.
    whh_all = params["w_hh"].T.astype(jnp.bfloat16)
    w1 = params["fc1_w"].T.astype(jnp.bfloat16)                      # (H, H2)
    w2 = params["fc2_w"].T.astype(jnp.bfloat16)                      # (H2, O)

    vmem = pl.BlockSpec(memory_space=pltpu.MemorySpace.VMEM)
    out_bto, h_n, c_n = pl.pallas_call(
        lstm_mlp_kernel,
        out_shape=(
            jax.ShapeDtypeStruct((B, T, O), jnp.float32),
            jax.ShapeDtypeStruct((B, H), jnp.float32),
            jax.ShapeDtypeStruct((B, H), jnp.float32),
        ),
        in_specs=[vmem] * 8,          # whole arrays resident in VMEM, one shot
        out_specs=(vmem, vmem, vmem),
    )(gx, whh_all, h0[0], c0[0],
      w1, params["fc1_b"].reshape(1, H2),
      w2, params["fc2_b"].reshape(1, O))

    # (B, T, O) -> (B*T, O) is a free contiguous reshape; row order b*T + t
    # matches torch's lstm_out.contiguous().view(-1, H) -> fc head.
    return out_bto.reshape(B * T, O), (h_n[None], c_n[None])


# ----------------------------------------------------------------------------
# Pure-JAX f32 reference (silent correctness check)
# ----------------------------------------------------------------------------
def char_lstm_reference(tokens, hidden, params):
    h, c = hidden[0][0], hidden[1][0]
    embeds = jnp.take(params["embedding"], tokens, axis=0)      # (B, T, E)
    H = params["w_hh"].shape[1]

    def step(carry, x_t):
        h, c = carry
        gates = (x_t @ params["w_ih"].T + params["b_ih"]
                 + h @ params["w_hh"].T + params["b_hh"])
        i = jax.nn.sigmoid(gates[:, 0 * H:1 * H])
        f = jax.nn.sigmoid(gates[:, 1 * H:2 * H])
        g = jnp.tanh(gates[:, 2 * H:3 * H])
        o = jax.nn.sigmoid(gates[:, 3 * H:4 * H])
        c = f * c + i * g
        h = o * jnp.tanh(c)
        return (h, c), h

    (h, c), outs = lax.scan(step, (h, c), jnp.transpose(embeds, (1, 0, 2)))
    lstm_out = jnp.transpose(outs, (1, 0, 2)).reshape(-1, H)
    hid = jnp.maximum(lstm_out @ params["fc1_w"].T + params["fc1_b"], 0.0)
    out = hid @ params["fc2_w"].T + params["fc2_b"]
    return out, (h[None], c[None])


# ----------------------------------------------------------------------------
# Main
# ----------------------------------------------------------------------------
if __name__ == "__main__":
    # Small shapes consistent with the module
    V = 32          # input_size (vocab)
    E = 16          # embedding_dim
    H = 32          # hidden_size
    O = 32          # output_size
    B, T = 2, 8     # batch, seq_len

    key = jax.random.PRNGKey(0)
    keys = jax.random.split(key, 10)
    scale = 0.1
    params = {
        "embedding": jax.random.normal(keys[0], (V, E), jnp.float32) * scale,
        "w_ih": jax.random.normal(keys[1], (4 * H, E), jnp.float32) * scale,
        "w_hh": jax.random.normal(keys[2], (4 * H, H), jnp.float32) * scale,
        "b_ih": jax.random.normal(keys[3], (4 * H,), jnp.float32) * scale,
        "b_hh": jax.random.normal(keys[4], (4 * H,), jnp.float32) * scale,
        "fc1_w": jax.random.normal(keys[5], (H // 2, H), jnp.float32) * scale,
        "fc1_b": jax.random.normal(keys[6], (H // 2,), jnp.float32) * scale,
        "fc2_w": jax.random.normal(keys[7], (O, H // 2), jnp.float32) * scale,
        "fc2_b": jax.random.normal(keys[8], (O,), jnp.float32) * scale,
    }

    tokens = jax.random.randint(keys[9], (B, T), 0, V, dtype=jnp.int32)
    hidden = (jnp.zeros((1, B, H), jnp.float32), jnp.zeros((1, B, H), jnp.float32))

    fwd = jax.jit(char_lstm_forward)
    out, (h_n, c_n) = fwd(tokens, hidden, params)
    jax.block_until_ready((out, h_n, c_n))

    out_ref, (h_ref, c_ref) = char_lstm_reference(tokens, hidden, params)
    # Tolerance loosened vs. the f32 reference: the kernel feeds the MXU bf16
    # operands (f32 accumulation), per the performance review.
    np.testing.assert_allclose(np.asarray(out), np.asarray(out_ref), atol=1e-2, rtol=1e-2)
    np.testing.assert_allclose(np.asarray(h_n), np.asarray(h_ref), atol=1e-2, rtol=1e-2)
    np.testing.assert_allclose(np.asarray(c_n), np.asarray(c_ref), atol=1e-2, rtol=1e-2)

    print("KERNEL_OK")
</pallas_src>

<mosaic_0001>
module attributes {stable_mosaic.version = 11 : i64} {
  func.func @lstm_mlp_kernel(%arg0: memref<16x128xf32, #tpu.memory_space<vmem>>, %arg1: memref<32x128xbf16, #tpu.memory_space<vmem>>, %arg2: memref<2x32xf32, #tpu.memory_space<vmem>>, %arg3: memref<2x32xf32, #tpu.memory_space<vmem>>, %arg4: memref<32x16xbf16, #tpu.memory_space<vmem>>, %arg5: memref<1x16xf32, #tpu.memory_space<vmem>>, %arg6: memref<16x32xbf16, #tpu.memory_space<vmem>>, %arg7: memref<1x32xf32, #tpu.memory_space<vmem>>, %arg8: memref<2x8x32xf32, #tpu.memory_space<vmem>>, %arg9: memref<2x32xf32, #tpu.memory_space<vmem>>, %arg10: memref<2x32xf32, #tpu.memory_space<vmem>>) attributes {dimension_semantics = [], scalar_prefetch = 0 : i64, scratch_operands = 0 : i64, tpu.core_type = #tpu.core_type<tc>} {
    %c0 = arith.constant 0 : index
    %c0_0 = arith.constant 0 : index
    %0 = vector.load %arg1[%c0, %c0_0] : memref<32x128xbf16, #tpu.memory_space<vmem>>, vector<32x128xbf16>
    %c0_1 = arith.constant 0 : index
    %c0_2 = arith.constant 0 : index
    %1 = vector.load %arg4[%c0_1, %c0_2] : memref<32x16xbf16, #tpu.memory_space<vmem>>, vector<32x16xbf16>
    %c0_3 = arith.constant 0 : index
    %c0_4 = arith.constant 0 : index
    %2 = vector.load %arg5[%c0_3, %c0_4] : memref<1x16xf32, #tpu.memory_space<vmem>>, vector<1x16xf32>
    %c0_5 = arith.constant 0 : index
    %c0_6 = arith.constant 0 : index
    %3 = vector.load %arg6[%c0_5, %c0_6] : memref<16x32xbf16, #tpu.memory_space<vmem>>, vector<16x32xbf16>
    %c0_7 = arith.constant 0 : index
    %c0_8 = arith.constant 0 : index
    %4 = vector.load %arg7[%c0_7, %c0_8] : memref<1x32xf32, #tpu.memory_space<vmem>>, vector<1x32xf32>
    %c0_9 = arith.constant 0 : index
    %c0_10 = arith.constant 0 : index
    %5 = vector.load %arg2[%c0_9, %c0_10] : memref<2x32xf32, #tpu.memory_space<vmem>>, vector<2x32xf32>
    %c0_11 = arith.constant 0 : index
    %c0_12 = arith.constant 0 : index
    %6 = vector.load %arg3[%c0_11, %c0_12] : memref<2x32xf32, #tpu.memory_space<vmem>>, vector<2x32xf32>
    %c0_13 = arith.constant 0 : index
    %c0_14 = arith.constant 0 : index
    %7 = vector.load %arg0[%c0_13, %c0_14] : memref<16x128xf32, #tpu.memory_space<vmem>>, vector<2x128xf32>
    %8 = arith.truncf %5 : vector<2x32xf32> to vector<2x32xbf16>
    %cst = arith.constant dense<0.000000e+00> : vector<2x128xf32>
    %9 = tpu.matmul %8, %0, %cst {dimension_numbers = #tpu.dot_dimension_numbers<[1], [0], [0], [1], [0, 0, 1, 1], [], []>} : vector<2x32xbf16>, vector<32x128xbf16>, vector<2x128xf32> -> vector<2x128xf32>
    %10 = arith.addf %7, %9 : vector<2x128xf32>
    %11 = arith.negf %10 : vector<2x128xf32>
    %12 = math.exp %11 : vector<2x128xf32>
    %cst_15 = arith.constant 1.000000e+00 : f32
    %13 = vector.broadcast %cst_15 : f32 to vector<2x128xf32>
    %14 = arith.addf %13, %12 : vector<2x128xf32>
    %15 = arith.divf %13, %14 : vector<2x128xf32>
    %16 = math.tanh %10 : vector<2x128xf32>
    %17 = vector.extract_strided_slice %15 {offsets = [0, 0], sizes = [2, 32], strides = [1, 1]} : vector<2x128xf32> to vector<2x32xf32>
    %18 = vector.extract_strided_slice %15 {offsets = [0, 32], sizes = [2, 32], strides = [1, 1]} : vector<2x128xf32> to vector<2x32xf32>
    %19 = vector.extract_strided_slice %16 {offsets = [0, 64], sizes = [2, 32], strides = [1, 1]} : vector<2x128xf32> to vector<2x32xf32>
    %20 = vector.extract_strided_slice %15 {offsets = [0, 96], sizes = [2, 32], strides = [1, 1]} : vector<2x128xf32> to vector<2x32xf32>
    %21 = arith.mulf %18, %6 : vector<2x32xf32>
    %22 = arith.mulf %17, %19 : vector<2x32xf32>
    %23 = arith.addf %21, %22 : vector<2x32xf32>
    %24 = math.tanh %23 : vector<2x32xf32>
    %25 = arith.mulf %20, %24 : vector<2x32xf32>
    %26 = arith.truncf %25 : vector<2x32xf32> to vector<2x32xbf16>
    %cst_16 = arith.constant dense<0.000000e+00> : vector<2x16xf32>
    %27 = tpu.matmul %26, %1, %cst_16 {dimension_numbers = #tpu.dot_dimension_numbers<[1], [0], [0], [1], [0, 0, 1, 1], [], []>} : vector<2x32xbf16>, vector<32x16xbf16>, vector<2x16xf32> -> vector<2x16xf32>
    %28 = vector.broadcast %2 : vector<1x16xf32> to vector<2x16xf32>
    %29 = arith.addf %27, %28 : vector<2x16xf32>
    %cst_17 = arith.constant 0.000000e+00 : f32
    %30 = vector.broadcast %cst_17 : f32 to vector<2x16xf32>
    %31 = arith.maximumf %29, %30 : vector<2x16xf32>
    %32 = arith.truncf %31 : vector<2x16xf32> to vector<2x16xbf16>
    %cst_18 = arith.constant dense<0.000000e+00> : vector<2x32xf32>
    %33 = tpu.matmul %32, %3, %cst_18 {dimension_numbers = #tpu.dot_dimension_numbers<[1], [0], [0], [1], [0, 0, 1, 1], [], []>} : vector<2x16xbf16>, vector<16x32xbf16>, vector<2x32xf32> -> vector<2x32xf32>
    %34 = vector.broadcast %4 : vector<1x32xf32> to vector<2x32xf32>
    %35 = arith.addf %33, %34 : vector<2x32xf32>
    %c0_19 = arith.constant 0 : index
    %c0_20 = arith.constant 0 : index
    %c0_21 = arith.constant 0 : index
    %36 = vector.load %arg8[%c0_19, %c0_20, %c0_21] : memref<2x8x32xf32, #tpu.memory_space<vmem>>, vector<2x1x32xf32>
    %37 = vector.shape_cast %36 : vector<2x1x32xf32> to vector<2x32xf32>
    %38 = vector.shape_cast %35 : vector<2x32xf32> to vector<2x1x32xf32>
    tpu.vector_store %arg8[%c0_19, %c0_20, %c0_21], %38 {strides = array<i32>} : memref<2x8x32xf32, #tpu.memory_space<vmem>>, vector<2x1x32xf32>,
    %c2 = arith.constant 2 : index
    %c0_22 = arith.constant 0 : index
    %39 = vector.load %arg0[%c2, %c0_22] : memref<16x128xf32, #tpu.memory_space<vmem>>, vector<2x128xf32>
    %40 = arith.truncf %25 : vector<2x32xf32> to vector<2x32xbf16>
    %cst_23 = arith.constant dense<0.000000e+00> : vector<2x128xf32>
    %41 = tpu.matmul %40, %0, %cst_23 {dimension_numbers = #tpu.dot_dimension_numbers<[1], [0], [0], [1], [0, 0, 1, 1], [], []>} : vector<2x32xbf16>, vector<32x128xbf16>, vector<2x128xf32> -> vector<2x128xf32>
    %42 = arith.addf %39, %41 : vector<2x128xf32>
    %43 = arith.negf %42 : vector<2x128xf32>
    %44 = math.exp %43 : vector<2x128xf32>
    %cst_24 = arith.constant 1.000000e+00 : f32
    %45 = vector.broadcast %cst_24 : f32 to vector<2x128xf32>
    %46 = arith.addf %45, %44 : vector<2x128xf32>
    %47 = arith.divf %45, %46 : vector<2x128xf32>
    %48 = math.tanh %42 : vector<2x128xf32>
    %49 = vector.extract_strided_slice %47 {offsets = [0, 0], sizes = [2, 32], strides = [1, 1]} : vector<2x128xf32> to vector<2x32xf32>
    %50 = vector.extract_strided_slice %47 {offsets = [0, 32], sizes = [2, 32], strides = [1, 1]} : vector<2x128xf32> to vector<2x32xf32>
    %51 = vector.extract_strided_slice %48 {offsets = [0, 64], sizes = [2, 32], strides = [1, 1]} : vector<2x128xf32> to vector<2x32xf32>
    %52 = vector.extract_strided_slice %47 {offsets = [0, 96], sizes = [2, 32], strides = [1, 1]} : vector<2x128xf32> to vector<2x32xf32>
    %53 = arith.mulf %50, %23 : vector<2x32xf32>
    %54 = arith.mulf %49, %51 : vector<2x32xf32>
    %55 = arith.addf %53, %54 : vector<2x32xf32>
    %56 = math.tanh %55 : vector<2x32xf32>
    %57 = arith.mulf %52, %56 : vector<2x32xf32>
    %58 = arith.truncf %57 : vector<2x32xf32> to vector<2x32xbf16>
    %cst_25 = arith.constant dense<0.000000e+00> : vector<2x16xf32>
    %59 = tpu.matmul %58, %1, %cst_25 {dimension_numbers = #tpu.dot_dimension_numbers<[1], [0], [0], [1], [0, 0, 1, 1], [], []>} : vector<2x32xbf16>, vector<32x16xbf16>, vector<2x16xf32> -> vector<2x16xf32>
    %60 = vector.broadcast %2 : vector<1x16xf32> to vector<2x16xf32>
    %61 = arith.addf %59, %60 : vector<2x16xf32>
    %cst_26 = arith.constant 0.000000e+00 : f32
    %62 = vector.broadcast %cst_26 : f32 to vector<2x16xf32>
    %63 = arith.maximumf %61, %62 : vector<2x16xf32>
    %64 = arith.truncf %63 : vector<2x16xf32> to vector<2x16xbf16>
    %cst_27 = arith.constant dense<0.000000e+00> : vector<2x32xf32>
    %65 = tpu.matmul %64, %3, %cst_27 {dimension_numbers = #tpu.dot_dimension_numbers<[1], [0], [0], [1], [0, 0, 1, 1], [], []>} : vector<2x16xbf16>, vector<16x32xbf16>, vector<2x32xf32> -> vector<2x32xf32>
    %66 = vector.broadcast %4 : vector<1x32xf32> to vector<2x32xf32>
    %67 = arith.addf %65, %66 : vector<2x32xf32>
    %c0_28 = arith.constant 0 : index
    %c1 = arith.constant 1 : index
    %c0_29 = arith.constant 0 : index
    %68 = vector.load %arg8[%c0_28, %c1, %c0_29] : memref<2x8x32xf32, #tpu.memory_space<vmem>>, vector<2x1x32xf32>
    %69 = vector.shape_cast %68 : vector<2x1x32xf32> to vector<2x32xf32>
    %70 = vector.shape_cast %67 : vector<2x32xf32> to vector<2x1x32xf32>
    tpu.vector_store %arg8[%c0_28, %c1, %c0_29], %70 {strides = array<i32>} : memref<2x8x32xf32, #tpu.memory_space<vmem>>, vector<2x1x32xf32>,
    %c4 = arith.constant 4 : index
    %c0_30 = arith.constant 0 : index
    %71 = vector.load %arg0[%c4, %c0_30] : memref<16x128xf32, #tpu.memory_space<vmem>>, vector<2x128xf32>
    %72 = arith.truncf %57 : vector<2x32xf32> to vector<2x32xbf16>
    %cst_31 = arith.constant dense<0.000000e+00> : vector<2x128xf32>
    %73 = tpu.matmul %72, %0, %cst_31 {dimension_numbers = #tpu.dot_dimension_numbers<[1], [0], [0], [1], [0, 0, 1, 1], [], []>} : vector<2x32xbf16>, vector<32x128xbf16>, vector<2x128xf32> -> vector<2x128xf32>
    %74 = arith.addf %71, %73 : vector<2x128xf32>
    %75 = arith.negf %74 : vector<2x128xf32>
    %76 = math.exp %75 : vector<2x128xf32>
    %cst_32 = arith.constant 1.000000e+00 : f32
    %77 = vector.broadcast %cst_32 : f32 to vector<2x128xf32>
    %78 = arith.addf %77, %76 : vector<2x128xf32>
    %79 = arith.divf %77, %78 : vector<2x128xf32>
    %80 = math.tanh %74 : vector<2x128xf32>
    %81 = vector.extract_strided_slice %79 {offsets = [0, 0], sizes = [2, 32], strides = [1, 1]} : vector<2x128xf32> to vector<2x32xf32>
    %82 = vector.extract_strided_slice %79 {offsets = [0, 32], sizes = [2, 32], strides = [1, 1]} : vector<2x128xf32> to vector<2x32xf32>
    %83 = vector.extract_strided_slice %80 {offsets = [0, 64], sizes = [2, 32], strides = [1, 1]} : vector<2x128xf32> to vector<2x32xf32>
    %84 = vector.extract_strided_slice %79 {offsets = [0, 96], sizes = [2, 32], strides = [1, 1]} : vector<2x128xf32> to vector<2x32xf32>
    %85 = arith.mulf %82, %55 : vector<2x32xf32>
    %86 = arith.mulf %81, %83 : vector<2x32xf32>
    %87 = arith.addf %85, %86 : vector<2x32xf32>
    %88 = math.tanh %87 : vector<2x32xf32>
    %89 = arith.mulf %84, %88 : vector<2x32xf32>
    %90 = arith.truncf %89 : vector<2x32xf32> to vector<2x32xbf16>
    %cst_33 = arith.constant dense<0.000000e+00> : vector<2x16xf32>
    %91 = tpu.matmul %90, %1, %cst_33 {dimension_numbers = #tpu.dot_dimension_numbers<[1], [0], [0], [1], [0, 0, 1, 1], [], []>} : vector<2x32xbf16>, vector<32x16xbf16>, vector<2x16xf32> -> vector<2x16xf32>
    %92 = vector.broadcast %2 : vector<1x16xf32> to vector<2x16xf32>
    %93 = arith.addf %91, %92 : vector<2x16xf32>
    %cst_34 = arith.constant 0.000000e+00 : f32
    %94 = vector.broadcast %cst_34 : f32 to vector<2x16xf32>
    %95 = arith.maximumf %93, %94 : vector<2x16xf32>
    %96 = arith.truncf %95 : vector<2x16xf32> to vector<2x16xbf16>
    %cst_35 = arith.constant dense<0.000000e+00> : vector<2x32xf32>
    %97 = tpu.matmul %96, %3, %cst_35 {dimension_numbers = #tpu.dot_dimension_numbers<[1], [0], [0], [1], [0, 0, 1, 1], [], []>} : vector<2x16xbf16>, vector<16x32xbf16>, vector<2x32xf32> -> vector<2x32xf32>
    %98 = vector.broadcast %4 : vector<1x32xf32> to vector<2x32xf32>
    %99 = arith.addf %97, %98 : vector<2x32xf32>
    %c0_36 = arith.constant 0 : index
    %c2_37 = arith.constant 2 : index
    %c0_38 = arith.constant 0 : index
    %100 = vector.load %arg8[%c0_36, %c2_37, %c0_38] : memref<2x8x32xf32, #tpu.memory_space<vmem>>, vector<2x1x32xf32>
    %101 = vector.shape_cast %100 : vector<2x1x32xf32> to vector<2x32xf32>
    %102 = vector.shape_cast %99 : vector<2x32xf32> to vector<2x1x32xf32>
    tpu.vector_store %arg8[%c0_36, %c2_37, %c0_38], %102 {strides = array<i32>} : memref<2x8x32xf32, #tpu.memory_space<vmem>>, vector<2x1x32xf32>,
    %c6 = arith.constant 6 : index
    %c0_39 = arith.constant 0 : index
    %103 = vector.load %arg0[%c6, %c0_39] : memref<16x128xf32, #tpu.memory_space<vmem>>, vector<2x128xf32>
    %104 = arith.truncf %89 : vector<2x32xf32> to vector<2x32xbf16>
    %cst_40 = arith.constant dense<0.000000e+00> : vector<2x128xf32>
    %105 = tpu.matmul %104, %0, %cst_40 {dimension_numbers = #tpu.dot_dimension_numbers<[1], [0], [0], [1], [0, 0, 1, 1], [], []>} : vector<2x32xbf16>, vector<32x128xbf16>, vector<2x128xf32> -> vector<2x128xf32>
    %106 = arith.addf %103, %105 : vector<2x128xf32>
    %107 = arith.negf %106 : vector<2x128xf32>
    %108 = math.exp %107 : vector<2x128xf32>
    %cst_41 = arith.constant 1.000000e+00 : f32
    %109 = vector.broadcast %cst_41 : f32 to vector<2x128xf32>
    %110 = arith.addf %109, %108 : vector<2x128xf32>
    %111 = arith.divf %109, %110 : vector<2x128xf32>
    %112 = math.tanh %106 : vector<2x128xf32>
    %113 = vector.extract_strided_slice %111 {offsets = [0, 0], sizes = [2, 32], strides = [1, 1]} : vector<2x128xf32> to vector<2x32xf32>
    %114 = vector.extract_strided_slice %111 {offsets = [0, 32], sizes = [2, 32], strides = [1, 1]} : vector<2x128xf32> to vector<2x32xf32>
    %115 = vector.extract_strided_slice %112 {offsets = [0, 64], sizes = [2, 32], strides = [1, 1]} : vector<2x128xf32> to vector<2x32xf32>
    %116 = vector.extract_strided_slice %111 {offsets = [0, 96], sizes = [2, 32], strides = [1, 1]} : vector<2x128xf32> to vector<2x32xf32>
    %117 = arith.mulf %114, %87 : vector<2x32xf32>
    %118 = arith.mulf %113, %115 : vector<2x32xf32>
    %119 = arith.addf %117, %118 : vector<2x32xf32>
    %120 = math.tanh %119 : vector<2x32xf32>
    %121 = arith.mulf %116, %120 : vector<2x32xf32>
    %122 = arith.truncf %121 : vector<2x32xf32> to vector<2x32xbf16>
    %cst_42 = arith.constant dense<0.000000e+00> : vector<2x16xf32>
    %123 = tpu.matmul %122, %1, %cst_42 {dimension_numbers = #tpu.dot_dimension_numbers<[1], [0], [0], [1], [0, 0, 1, 1], [], []>} : vector<2x32xbf16>, vector<32x16xbf16>, vector<2x16xf32> -> vector<2x16xf32>
    %124 = vector.broadcast %2 : vector<1x16xf32> to vector<2x16xf32>
    %125 = arith.addf %123, %124 : vector<2x16xf32>
    %cst_43 = arith.constant 0.000000e+00 : f32
    %126 = vector.broadcast %cst_43 : f32 to vector<2x16xf32>
    %127 = arith.maximumf %125, %126 : vector<2x16xf32>
    %128 = arith.truncf %127 : vector<2x16xf32> to vector<2x16xbf16>
    %cst_44 = arith.constant dense<0.000000e+00> : vector<2x32xf32>
    %129 = tpu.matmul %128, %3, %cst_44 {dimension_numbers = #tpu.dot_dimension_numbers<[1], [0], [0], [1], [0, 0, 1, 1], [], []>} : vector<2x16xbf16>, vector<16x32xbf16>, vector<2x32xf32> -> vector<2x32xf32>
    %130 = vector.broadcast %4 : vector<1x32xf32> to vector<2x32xf32>
    %131 = arith.addf %129, %130 : vector<2x32xf32>
    %c0_45 = arith.constant 0 : index
    %c3 = arith.constant 3 : index
    %c0_46 = arith.constant 0 : index
    %132 = vector.load %arg8[%c0_45, %c3, %c0_46] : memref<2x8x32xf32, #tpu.memory_space<vmem>>, vector<2x1x32xf32>
    %133 = vector.shape_cast %132 : vector<2x1x32xf32> to vector<2x32xf32>
    %134 = vector.shape_cast %131 : vector<2x32xf32> to vector<2x1x32xf32>
    tpu.vector_store %arg8[%c0_45, %c3, %c0_46], %134 {strides = array<i32>} : memref<2x8x32xf32, #tpu.memory_space<vmem>>, vector<2x1x32xf32>,
    %c8 = arith.constant 8 : index
    %c0_47 = arith.constant 0 : index
    %135 = vector.load %arg0[%c8, %c0_47] : memref<16x128xf32, #tpu.memory_space<vmem>>, vector<2x128xf32>
    %136 = arith.truncf %121 : vector<2x32xf32> to vector<2x32xbf16>
    %cst_48 = arith.constant dense<0.000000e+00> : vector<2x128xf32>
    %137 = tpu.matmul %136, %0, %cst_48 {dimension_numbers = #tpu.dot_dimension_numbers<[1], [0], [0], [1], [0, 0, 1, 1], [], []>} : vector<2x32xbf16>, vector<32x128xbf16>, vector<2x128xf32> -> vector<2x128xf32>
    %138 = arith.addf %135, %137 : vector<2x128xf32>
    %139 = arith.negf %138 : vector<2x128xf32>
    %140 = math.exp %139 : vector<2x128xf32>
    %cst_49 = arith.constant 1.000000e+00 : f32
    %141 = vector.broadcast %cst_49 : f32 to vector<2x128xf32>
    %142 = arith.addf %141, %140 : vector<2x128xf32>
    %143 = arith.divf %141, %142 : vector<2x128xf32>
    %144 = math.tanh %138 : vector<2x128xf32>
    %145 = vector.extract_strided_slice %143 {offsets = [0, 0], sizes = [2, 32], strides = [1, 1]} : vector<2x128xf32> to vector<2x32xf32>
    %146 = vector.extract_strided_slice %143 {offsets = [0, 32], sizes = [2, 32], strides = [1, 1]} : vector<2x128xf32> to vector<2x32xf32>
    %147 = vector.extract_strided_slice %144 {offsets = [0, 64], sizes = [2, 32], strides = [1, 1]} : vector<2x128xf32> to vector<2x32xf32>
    %148 = vector.extract_strided_slice %143 {offsets = [0, 96], sizes = [2, 32], strides = [1, 1]} : vector<2x128xf32> to vector<2x32xf32>
    %149 = arith.mulf %146, %119 : vector<2x32xf32>
    %150 = arith.mulf %145, %147 : vector<2x32xf32>
    %151 = arith.addf %149, %150 : vector<2x32xf32>
    %152 = math.tanh %151 : vector<2x32xf32>
    %153 = arith.mulf %148, %152 : vector<2x32xf32>
    %154 = arith.truncf %153 : vector<2x32xf32> to vector<2x32xbf16>
    %cst_50 = arith.constant dense<0.000000e+00> : vector<2x16xf32>
    %155 = tpu.matmul %154, %1, %cst_50 {dimension_numbers = #tpu.dot_dimension_numbers<[1], [0], [0], [1], [0, 0, 1, 1], [], []>} : vector<2x32xbf16>, vector<32x16xbf16>, vector<2x16xf32> -> vector<2x16xf32>
    %156 = vector.broadcast %2 : vector<1x16xf32> to vector<2x16xf32>
    %157 = arith.addf %155, %156 : vector<2x16xf32>
    %cst_51 = arith.constant 0.000000e+00 : f32
    %158 = vector.broadcast %cst_51 : f32 to vector<2x16xf32>
    %159 = arith.maximumf %157, %158 : vector<2x16xf32>
    %160 = arith.truncf %159 : vector<2x16xf32> to vector<2x16xbf16>
    %cst_52 = arith.constant dense<0.000000e+00> : vector<2x32xf32>
    %161 = tpu.matmul %160, %3, %cst_52 {dimension_numbers = #tpu.dot_dimension_numbers<[1], [0], [0], [1], [0, 0, 1, 1], [], []>} : vector<2x16xbf16>, vector<16x32xbf16>, vector<2x32xf32> -> vector<2x32xf32>
    %162 = vector.broadcast %4 : vector<1x32xf32> to vector<2x32xf32>
    %163 = arith.addf %161, %162 : vector<2x32xf32>
    %c0_53 = arith.constant 0 : index
    %c4_54 = arith.constant 4 : index
    %c0_55 = arith.constant 0 : index
    %164 = vector.load %arg8[%c0_53, %c4_54, %c0_55] : memref<2x8x32xf32, #tpu.memory_space<vmem>>, vector<2x1x32xf32>
    %165 = vector.shape_cast %164 : vector<2x1x32xf32> to vector<2x32xf32>
    %166 = vector.shape_cast %163 : vector<2x32xf32> to vector<2x1x32xf32>
    tpu.vector_store %arg8[%c0_53, %c4_54, %c0_55], %166 {strides = array<i32>} : memref<2x8x32xf32, #tpu.memory_space<vmem>>, vector<2x1x32xf32>,
    %c10 = arith.constant 10 : index
    %c0_56 = arith.constant 0 : index
    %167 = vector.load %arg0[%c10, %c0_56] : memref<16x128xf32, #tpu.memory_space<vmem>>, vector<2x128xf32>
    %168 = arith.truncf %153 : vector<2x32xf32> to vector<2x32xbf16>
    %cst_57 = arith.constant dense<0.000000e+00> : vector<2x128xf32>
    %169 = tpu.matmul %168, %0, %cst_57 {dimension_numbers = #tpu.dot_dimension_numbers<[1], [0], [0], [1], [0, 0, 1, 1], [], []>} : vector<2x32xbf16>, vector<32x128xbf16>, vector<2x128xf32> -> vector<2x128xf32>
    %170 = arith.addf %167, %169 : vector<2x128xf32>
    %171 = arith.negf %170 : vector<2x128xf32>
    %172 = math.exp %171 : vector<2x128xf32>
    %cst_58 = arith.constant 1.000000e+00 : f32
    %173 = vector.broadcast %cst_58 : f32 to vector<2x128xf32>
    %174 = arith.addf %173, %172 : vector<2x128xf32>
    %175 = arith.divf %173, %174 : vector<2x128xf32>
    %176 = math.tanh %170 : vector<2x128xf32>
    %177 = vector.extract_strided_slice %175 {offsets = [0, 0], sizes = [2, 32], strides = [1, 1]} : vector<2x128xf32> to vector<2x32xf32>
    %178 = vector.extract_strided_slice %175 {offsets = [0, 32], sizes = [2, 32], strides = [1, 1]} : vector<2x128xf32> to vector<2x32xf32>
    %179 = vector.extract_strided_slice %176 {offsets = [0, 64], sizes = [2, 32], strides = [1, 1]} : vector<2x128xf32> to vector<2x32xf32>
    %180 = vector.extract_strided_slice %175 {offsets = [0, 96], sizes = [2, 32], strides = [1, 1]} : vector<2x128xf32> to vector<2x32xf32>
    %181 = arith.mulf %178, %151 : vector<2x32xf32>
    %182 = arith.mulf %177, %179 : vector<2x32xf32>
    %183 = arith.addf %181, %182 : vector<2x32xf32>
    %184 = math.tanh %183 : vector<2x32xf32>
    %185 = arith.mulf %180, %184 : vector<2x32xf32>
    %186 = arith.truncf %185 : vector<2x32xf32> to vector<2x32xbf16>
    %cst_59 = arith.constant dense<0.000000e+00> : vector<2x16xf32>
    %187 = tpu.matmul %186, %1, %cst_59 {dimension_numbers = #tpu.dot_dimension_numbers<[1], [0], [0], [1], [0, 0, 1, 1], [], []>} : vector<2x32xbf16>, vector<32x16xbf16>, vector<2x16xf32> -> vector<2x16xf32>
    %188 = vector.broadcast %2 : vector<1x16xf32> to vector<2x16xf32>
    %189 = arith.addf %187, %188 : vector<2x16xf32>
    %cst_60 = arith.constant 0.000000e+00 : f32
    %190 = vector.broadcast %cst_60 : f32 to vector<2x16xf32>
    %191 = arith.maximumf %189, %190 : vector<2x16xf32>
    %192 = arith.truncf %191 : vector<2x16xf32> to vector<2x16xbf16>
    %cst_61 = arith.constant dense<0.000000e+00> : vector<2x32xf32>
    %193 = tpu.matmul %192, %3, %cst_61 {dimension_numbers = #tpu.dot_dimension_numbers<[1], [0], [0], [1], [0, 0, 1, 1], [], []>} : vector<2x16xbf16>, vector<16x32xbf16>, vector<2x32xf32> -> vector<2x32xf32>
    %194 = vector.broadcast %4 : vector<1x32xf32> to vector<2x32xf32>
    %195 = arith.addf %193, %194 : vector<2x32xf32>
    %c0_62 = arith.constant 0 : index
    %c5 = arith.constant 5 : index
    %c0_63 = arith.constant 0 : index
    %196 = vector.load %arg8[%c0_62, %c5, %c0_63] : memref<2x8x32xf32, #tpu.memory_space<vmem>>, vector<2x1x32xf32>
    %197 = vector.shape_cast %196 : vector<2x1x32xf32> to vector<2x32xf32>
    %198 = vector.shape_cast %195 : vector<2x32xf32> to vector<2x1x32xf32>
    tpu.vector_store %arg8[%c0_62, %c5, %c0_63], %198 {strides = array<i32>} : memref<2x8x32xf32, #tpu.memory_space<vmem>>, vector<2x1x32xf32>,
    %c12 = arith.constant 12 : index
    %c0_64 = arith.constant 0 : index
    %199 = vector.load %arg0[%c12, %c0_64] : memref<16x128xf32, #tpu.memory_space<vmem>>, vector<2x128xf32>
    %200 = arith.truncf %185 : vector<2x32xf32> to vector<2x32xbf16>
    %cst_65 = arith.constant dense<0.000000e+00> : vector<2x128xf32>
    %201 = tpu.matmul %200, %0, %cst_65 {dimension_numbers = #tpu.dot_dimension_numbers<[1], [0], [0], [1], [0, 0, 1, 1], [], []>} : vector<2x32xbf16>, vector<32x128xbf16>, vector<2x128xf32> -> vector<2x128xf32>
    %202 = arith.addf %199, %201 : vector<2x128xf32>
    %203 = arith.negf %202 : vector<2x128xf32>
    %204 = math.exp %203 : vector<2x128xf32>
    %cst_66 = arith.constant 1.000000e+00 : f32
    %205 = vector.broadcast %cst_66 : f32 to vector<2x128xf32>
    %206 = arith.addf %205, %204 : vector<2x128xf32>
    %207 = arith.divf %205, %206 : vector<2x128xf32>
    %208 = math.tanh %202 : vector<2x128xf32>
    %209 = vector.extract_strided_slice %207 {offsets = [0, 0], sizes = [2, 32], strides = [1, 1]} : vector<2x128xf32> to vector<2x32xf32>
    %210 = vector.extract_strided_slice %207 {offsets = [0, 32], sizes = [2, 32], strides = [1, 1]} : vector<2x128xf32> to vector<2x32xf32>
    %211 = vector.extract_strided_slice %208 {offsets = [0, 64], sizes = [2, 32], strides = [1, 1]} : vector<2x128xf32> to vector<2x32xf32>
    %212 = vector.extract_strided_slice %207 {offsets = [0, 96], sizes = [2, 32], strides = [1, 1]} : vector<2x128xf32> to vector<2x32xf32>
    %213 = arith.mulf %210, %183 : vector<2x32xf32>
    %214 = arith.mulf %209, %211 : vector<2x32xf32>
    %215 = arith.addf %213, %214 : vector<2x32xf32>
    %216 = math.tanh %215 : vector<2x32xf32>
    %217 = arith.mulf %212, %216 : vector<2x32xf32>
    %218 = arith.truncf %217 : vector<2x32xf32> to vector<2x32xbf16>
    %cst_67 = arith.constant dense<0.000000e+00> : vector<2x16xf32>
    %219 = tpu.matmul %218, %1, %cst_67 {dimension_numbers = #tpu.dot_dimension_numbers<[1], [0], [0], [1], [0, 0, 1, 1], [], []>} : vector<2x32xbf16>, vector<32x16xbf16>, vector<2x16xf32> -> vector<2x16xf32>
    %220 = vector.broadcast %2 : vector<1x16xf32> to vector<2x16xf32>
    %221 = arith.addf %219, %220 : vector<2x16xf32>
    %cst_68 = arith.constant 0.000000e+00 : f32
    %222 = vector.broadcast %cst_68 : f32 to vector<2x16xf32>
    %223 = arith.maximumf %221, %222 : vector<2x16xf32>
    %224 = arith.truncf %223 : vector<2x16xf32> to vector<2x16xbf16>
    %cst_69 = arith.constant dense<0.000000e+00> : vector<2x32xf32>
    %225 = tpu.matmul %224, %3, %cst_69 {dimension_numbers = #tpu.dot_dimension_numbers<[1], [0], [0], [1], [0, 0, 1, 1], [], []>} : vector<2x16xbf16>, vector<16x32xbf16>, vector<2x32xf32> -> vector<2x32xf32>
    %226 = vector.broadcast %4 : vector<1x32xf32> to vector<2x32xf32>
    %227 = arith.addf %225, %226 : vector<2x32xf32>
    %c0_70 = arith.constant 0 : index
    %c6_71 = arith.constant 6 : index
    %c0_72 = arith.constant 0 : index
    %228 = vector.load %arg8[%c0_70, %c6_71, %c0_72] : memref<2x8x32xf32, #tpu.memory_space<vmem>>, vector<2x1x32xf32>
    %229 = vector.shape_cast %228 : vector<2x1x32xf32> to vector<2x32xf32>
    %230 = vector.shape_cast %227 : vector<2x32xf32> to vector<2x1x32xf32>
    tpu.vector_store %arg8[%c0_70, %c6_71, %c0_72], %230 {strides = array<i32>} : memref<2x8x32xf32, #tpu.memory_space<vmem>>, vector<2x1x32xf32>,
    %c14 = arith.constant 14 : index
    %c0_73 = arith.constant 0 : index
    %231 = vector.load %arg0[%c14, %c0_73] : memref<16x128xf32, #tpu.memory_space<vmem>>, vector<2x128xf32>
    %232 = arith.truncf %217 : vector<2x32xf32> to vector<2x32xbf16>
    %cst_74 = arith.constant dense<0.000000e+00> : vector<2x128xf32>
    %233 = tpu.matmul %232, %0, %cst_74 {dimension_numbers = #tpu.dot_dimension_numbers<[1], [0], [0], [1], [0, 0, 1, 1], [], []>} : vector<2x32xbf16>, vector<32x128xbf16>, vector<2x128xf32> -> vector<2x128xf32>
    %234 = arith.addf %231, %233 : vector<2x128xf32>
    %235 = arith.negf %234 : vector<2x128xf32>
    %236 = math.exp %235 : vector<2x128xf32>
    %cst_75 = arith.constant 1.000000e+00 : f32
    %237 = vector.broadcast %cst_75 : f32 to vector<2x128xf32>
    %238 = arith.addf %237, %236 : vector<2x128xf32>
    %239 = arith.divf %237, %238 : vector<2x128xf32>
    %240 = math.tanh %234 : vector<2x128xf32>
    %241 = vector.extract_strided_slice %239 {offsets = [0, 0], sizes = [2, 32], strides = [1, 1]} : vector<2x128xf32> to vector<2x32xf32>
    %242 = vector.extract_strided_slice %239 {offsets = [0, 32], sizes = [2, 32], strides = [1, 1]} : vector<2x128xf32> to vector<2x32xf32>
    %243 = vector.extract_strided_slice %240 {offsets = [0, 64], sizes = [2, 32], strides = [1, 1]} : vector<2x128xf32> to vector<2x32xf32>
    %244 = vector.extract_strided_slice %239 {offsets = [0, 96], sizes = [2, 32], strides = [1, 1]} : vector<2x128xf32> to vector<2x32xf32>
    %245 = arith.mulf %242, %215 : vector<2x32xf32>
    %246 = arith.mulf %241, %243 : vector<2x32xf32>
    %247 = arith.addf %245, %246 : vector<2x32xf32>
    %248 = math.tanh %247 : vector<2x32xf32>
    %249 = arith.mulf %244, %248 : vector<2x32xf32>
    %250 = arith.truncf %249 : vector<2x32xf32> to vector<2x32xbf16>
    %cst_76 = arith.constant dense<0.000000e+00> : vector<2x16xf32>
    %251 = tpu.matmul %250, %1, %cst_76 {dimension_numbers = #tpu.dot_dimension_numbers<[1], [0], [0], [1], [0, 0, 1, 1], [], []>} : vector<2x32xbf16>, vector<32x16xbf16>, vector<2x16xf32> -> vector<2x16xf32>
    %252 = vector.broadcast %2 : vector<1x16xf32> to vector<2x16xf32>
    %253 = arith.addf %251, %252 : vector<2x16xf32>
    %cst_77 = arith.constant 0.000000e+00 : f32
    %254 = vector.broadcast %cst_77 : f32 to vector<2x16xf32>
    %255 = arith.maximumf %253, %254 : vector<2x16xf32>
    %256 = arith.truncf %255 : vector<2x16xf32> to vector<2x16xbf16>
    %cst_78 = arith.constant dense<0.000000e+00> : vector<2x32xf32>
    %257 = tpu.matmul %256, %3, %cst_78 {dimension_numbers = #tpu.dot_dimension_numbers<[1], [0], [0], [1], [0, 0, 1, 1], [], []>} : vector<2x16xbf16>, vector<16x32xbf16>, vector<2x32xf32> -> vector<2x32xf32>
    %258 = vector.broadcast %4 : vector<1x32xf32> to vector<2x32xf32>
    %259 = arith.addf %257, %258 : vector<2x32xf32>
    %c0_79 = arith.constant 0 : index
    %c7 = arith.constant 7 : index
    %c0_80 = arith.constant 0 : index
    %260 = vector.load %arg8[%c0_79, %c7, %c0_80] : memref<2x8x32xf32, #tpu.memory_space<vmem>>, vector<2x1x32xf32>
    %261 = vector.shape_cast %260 : vector<2x1x32xf32> to vector<2x32xf32>
    %262 = vector.shape_cast %259 : vector<2x32xf32> to vector<2x1x32xf32>
    tpu.vector_store %arg8[%c0_79, %c7, %c0_80], %262 {strides = array<i32>} : memref<2x8x32xf32, #tpu.memory_space<vmem>>, vector<2x1x32xf32>,
    %c0_81 = arith.constant 0 : index
    %c0_82 = arith.constant 0 : index
    %263 = vector.load %arg9[%c0_81, %c0_82] : memref<2x32xf32, #tpu.memory_space<vmem>>, vector<2x32xf32>
    tpu.vector_store %arg9[%c0_81, %c0_82], %249 {strides = array<i32>} : memref<2x32xf32, #tpu.memory_space<vmem>>, vector<2x32xf32>,
    %c0_83 = arith.constant 0 : index
    %c0_84 = arith.constant 0 : index
    %264 = vector.load %arg10[%c0_83, %c0_84] : memref<2x32xf32, #tpu.memory_space<vmem>>, vector<2x32xf32>
    tpu.vector_store %arg10[%c0_83, %c0_84], %247 {strides = array<i32>} : memref<2x32xf32, #tpu.memory_space<vmem>>, vector<2x32xf32>,
    return
  }
}

</mosaic_0001>

<bundles_post_ra>
// kernel: char_lstm_forward.1
= control target key start
LH: loop header
LB: loop body
LE: loop exit
PB: predicated region body
PF: predicated region fallthrough
CT: control target
= control target key end

     0   :  { %16 = vsyncpa [#allocation3], 0  ;;  %s1394_s0 = inlined_call_operand.vmem [shape: f32[16,128], index: 0, kind: input, shape index: {}]   ;;  %s1395_s1 = inlined_call_operand.vmem [shape: bf16[32,128], index: 1, kind: input, shape index: {}]   ;;  %s1396_s2 = inlined_call_operand.vmem [shape: f32[2,32], index: 2, kind: input, shape index: {}]   ;;  %s1397_s3 = inlined_call_operand.vmem [shape: f32[2,32], index: 3, kind: input, shape index: {}]   ;;  %s1398_s4 = inlined_call_operand.vmem [shape: bf16[32,16], index: 4, kind: input, shape index: {}]   ;;  %s1399_s5 = inlined_call_operand.vmem [shape: f32[1,16], index: 5, kind: input, shape index: {}]   ;;  %s1400_s6 = inlined_call_operand.vmem [shape: bf16[16,32], index: 6, kind: input, shape index: {}]   ;;  %s1401_s7 = inlined_call_operand.vmem [shape: f32[1,32], index: 7, kind: input, shape index: {}]   ;;  %s1402_s8 = inlined_call_operand.hbm [shape: f32[2,8,32], index: 8, kind: output, shape index: {0}]   ;;  %s1403_s9 = inlined_call_operand.hbm [shape: f32[2,32], index: 9, kind: output, shape index: {1}]   ;;  %s1404_s10 = inlined_call_operand.hbm [shape: f32[2,32], index: 10, kind: output, shape index: {2}]  }
   0x1   :  { %v1189_v0 = vld [vmem:[%s1395_s1 + $0x8] sm:$0xff]  ;;  %v1195_v1 = vld [vmem:[%s1395_s1] sm:$0xff] }
   0x2   :  { %73 = vmatpush.bf16.msra.mxu0 %v1189_v0  ;;  %v47_v2 = vld [vmem:[%s1396_s2] sm:$0x3]  ;;  %198 = vmatpush.bf16.msra.mxu3 %v1189_v0 }
   0x3   :  { %17 = vsyncpa [#allocation5], 0  ;;  %v50_v3 = vpack.c.bf16 %v47_v2, %v47_v2  ;;  %vm63_vm0 = vcmask 261120   ;;  %v49_v4 = vld [vmem:[%s1394_s0] sm:$0x3]  ;;  %s1123_s1 = smov 64  }
   0x4   :  { %v48_v9 = vld [vmem:[%s1397_s3] sm:$0x3]  ;;  %s1124_s22 = smov 32   ;;  %v1220_v30 = vld [vmem:[%s1398_s4 + $0x8] sm:$0xff]  ;;  %v191_v41 = vld [vmem:[%s1394_s0 + $0x2] sm:$0x3] }
   0x5   :  { %150 = vmatpush.bf16.msra.mxu1 %v1220_v30  ;;  %v1226_v31 = vld [vmem:[%s1398_s4] sm:$0xff]  ;;  %vm168_vm5 = vcmask 130048   ;;  %vm188_vm10 = vcmask 253952   ;;  %s887_s23 = sshll.u32 %s1403_s9, 4  ;;  %s1127_s24 = smov [#allocation6]   ;;  %s888_s23 = int_to_ptr.hbm [resolvable:$true] %s887_s23 }
   0x6   :  { %74 = vmatpush.bf16.msra.mxu0 %v1195_v1  ;;  %199 = vmatpush.bf16.msra.mxu3 %v1195_v1  ;;  %v1241_v36 = vld [vmem:[%s1400_s6] sm:$0xff]  ;;  %s896_s25 = sshll.u32 %s1127_s24, 4  ;;  %s898_s27 = sshll.u32 %s1404_s10, 4  ;;  %s897_s25 = int_to_ptr.vmem [resolvable:$true] %s896_s25  ;;  %s899_s27 = int_to_ptr.hbm [resolvable:$true] %s898_s27 }
   0x7   :  { %179 = vmatpush.bf16.msra.mxu2 %v1241_v36  ;;  %v1253_v37 = vld [vmem:[%s1399_s5] ss:$0 sm:$0xff]  ;;  %s1128_s28 = smov [#allocation2]   ;;  %s873_s30 = sshll.u32 %s1402_s8, 4  ;;  %s874_s30 = int_to_ptr.hbm [resolvable:$true] %s873_s30 }
   0x8   :  { %v1266_v63 = vld [vmem:[%s1401_s7] ss:$0 sm:$0xff]  ;;  %s871_s6 = sshll.u32 %s1128_s28, 4  ;;  %s1129_s9 = smov 128   ;;  %s872_s6 = int_to_ptr.vmem [resolvable:$true] %s871_s6 }
   0x9   :  { %924 = vmatmul.msk.bf16.vlgmr.msra.gmra.mxu0 %vm63_vm0, %v50_v3  ;;  %151 = vmatpush.bf16.msra.mxu1 %v1226_v31  ;;  %s1130_s10 = smov 8  }
   0xa   :  { %351 = vmatpush.bf16.msrb.mxu3 %v1220_v30  ;;  %275 = vmatpush.bf16.msrb.mxu0 %v1241_v36 }
   0xb   :  { %256 = vmatpush.bf16.msrb.mxu2 %v1220_v30 }
   0xd   :  { %293 = vmatpush.bf16.msrb.mxu1 %v1189_v0 }
   0xe   :  { %352 = vmatpush.bf16.msrb.mxu3 %v1226_v31  ;;  %388 = vmatpush.bf16.msra.mxu0 %v1189_v0 }
   0xf   :  { %257 = vmatpush.bf16.msrb.mxu2 %v1226_v31 }
  0x11   :  { %294 = vmatpush.bf16.msrb.mxu1 %v1195_v1 }
  0x12   :  { %389 = vmatpush.bf16.msra.mxu0 %v1195_v1 }
  0x86   :  { %v76_v5 = vpop.f32.mrf.mxu0 }
  0x87   :  { %v80_v6 = vadd.f32 %v76_v5, %v49_v4 }
  0x89   :  { %983 = vtanh.f32 %v80_v6  ;;  %v925_v10 = vmul.f32 -1.442695, %v80_v6 }
  0x8b   :  { %985 = vpow2.f32 %v925_v10 }
  0x8e   :  { %v78_v7 = vpop.f32.mrf.mxu0 }
  0x8f   :  { %v984_v8 = vpop.eup %983 }
  0x90   :  { %107 = vrot.lane.b32.xlu0 %v984_v8, %s1123_s1 }
  0x91   :  { %v986_v11 = vpop.eup %985 }
  0x92   :  { %v84_v12 = vadd.f32 1.0, %v986_v11 }
  0x94   :  { %987 = vrcp.f32 %v84_v12  ;;  %v96_v18 = vand.u32 2147483648, %v84_v12  ;;  %vm90_vm2 = vweird.f32 %v84_v12  ;;  %v94_v19 = vand.u32 2147483647, %v84_v12 }
  0x96   :  { %v97_v21 = vor.u32 1.1754944e-38, %v96_v18  ;;  %vm95_vm4 = vcmp.eq.f32.partialorder %v94_v19, 8.507059e+37 }
  0x98   :  { %102 = vrot.lane.b32.xlu0 %v48_v9, %s1124_s22 }
  0x9a   :  { %v988_v13 = vpop.eup %987 }
  0x9b   :  { %v86_v14 = vmul.f32 %v988_v13, %v84_v12  ;;  %vm91_vm1 = vweird.f32 %v988_v13 }
  0x9c   :  { %vm92_vm3 = vmor %vm90_vm2, %vm91_vm1 }
  0x9d   :  { %v87_v15 = vsub.f32 1.0, %v86_v14  ;;  %v286_v14 = vld [vmem:[%s1394_s0 + $0x4] sm:$0x3] }
  0x9f   :  { %v88_v16 = vmul.f32 %v988_v13, %v87_v15 }
  0xa1   :  { %v89_v17 = vadd.f32 %v988_v13, %v88_v16 }
  0xa3   :  { %v93_v20 = vsel %vm92_vm3, %v988_v13, %v89_v17 }
  0xa4   :  { %v98_v23 = vsel %vm95_vm4, %v97_v21, %v93_v20 }
 0x102   :  { %v108_v22 = vpop.permute.xlu0 %107 }
 0x103   :  { %v110_v24 = vmul.f32 %v108_v22, %v98_v23 }
 0x105   :  { %112 = vrot.lane.b32.xlu1 %v110_v24, %s1124_s22 }
 0x10a   :  { %v103_v25 = vpop.permute.xlu0 %102 }
 0x10b   :  { %v105_v26 = vmul.f32 %v103_v25, %v98_v23 }
 0x177   :  { %v113_v27 = vpop.permute.xlu1 %112 }
 0x178   :  { %v1213_v28 = vadd.f32 %v113_v27, %v105_v26 }
 0x17a   :  { %989 = vtanh.f32 %v1213_v28 }
 0x180   :  { %v990_v29 = vpop.eup %989 }
 0x181   :  { %118 = vrot.lane.b32.xlu1 %v990_v29, %s1123_s1 }
 0x1f3   :  { %v119_v32 = vpop.permute.xlu1 %118 }
 0x1f4   :  { %v121_v33 = vmul.f32 %v119_v32, %v98_v23 }
 0x1f6   :  { %v122_v34 = vpack.c.bf16 %v121_v33, %v121_v33 }
 0x1f8   :  { %127 = vrot.lane.b32.xlu2 %v122_v34, %s1124_s22 }
 0x252   :  { %v128_v35 = vpop.permute.xlu2 %127 }
 0x253   :  { %934 = vmatmul.msk.bf16.vlgmr.msra.gmra.mxu1 %vm63_vm0, %v128_v35  ;;  %940 = vmatmul.msk.bf16.vlgmr.msra.gmra.mxu3 %vm63_vm0, %v128_v35 }
 0x254   :  { %446 = vmatpush.bf16.msra.mxu1 %v1220_v30  ;;  %465 = vmatpush.bf16.msra.mxu3 %v1241_v36 }
 0x258   :  { %447 = vmatpush.bf16.msra.mxu1 %v1226_v31 }
 0x2d0   :  { %v153_v38 = vpop.f32.mrf.mxu1 }
 0x2d1   :  { %v154_v39 = vadd.f32 %v1253_v37, %v153_v38 }
 0x2d3   :  { %v157_v40 = vmax.f32 %v154_v39, 0.0 }
 0x2d5   :  { %v158_v42 = vpack.c.bf16 %v157_v40, %v157_v40 }
 0x2d6   :  { %v201_v43 = vpop.f32.mrf.mxu3 }
 0x2d7   :  { %v205_v44 = vadd.f32 %v201_v43, %v191_v41  ;;  %939 = vmatmul.msk.bf16.vlgmr.msra.gmra.mxu2 %vm168_vm5, %v158_v42 }
 0x2d8   :  { %v155_v45 = vpop.f32.mrf.mxu1  ;;  %370 = vmatpush.bf16.msra.mxu2 %v1241_v36 }
 0x2d9   :  { %991 = vtanh.f32 %v205_v44  ;;  %v941_v48 = vmul.f32 -1.442695, %v205_v44 }
 0x2db   :  { %993 = vpow2.f32 %v941_v48 }
 0x2de   :  { %v203_v46 = vpop.f32.mrf.mxu3 }
 0x2df   :  { %v992_v47 = vpop.eup %991 }
 0x2e0   :  { %228 = vrot.lane.b32.xlu2 %v992_v47, %s1123_s1 }
 0x2e1   :  { %v994_v49 = vpop.eup %993 }
 0x2e2   :  { %v209_v50 = vadd.f32 1.0, %v994_v49 }
 0x2e4   :  { %995 = vrcp.f32 %v209_v50  ;;  %v221_v56 = vand.u32 2147483648, %v209_v50  ;;  %vm215_vm7 = vweird.f32 %v209_v50  ;;  %v219_v57 = vand.u32 2147483647, %v209_v50 }
 0x2e6   :  { %v222_v59 = vor.u32 1.1754944e-38, %v221_v56  ;;  %vm220_vm9 = vcmp.eq.f32.partialorder %v219_v57, 8.507059e+37 }
 0x2ea   :  { %v996_v51 = vpop.eup %995 }
 0x2eb   :  { %v211_v52 = vmul.f32 %v996_v51, %v209_v50  ;;  %vm216_vm6 = vweird.f32 %v996_v51 }
 0x2ec   :  { %vm217_vm8 = vmor %vm215_vm7, %vm216_vm6 }
 0x2ed   :  { %v212_v53 = vsub.f32 1.0, %v211_v52 }
 0x2ef   :  { %v213_v54 = vmul.f32 %v996_v51, %v212_v53 }
 0x2f1   :  { %v214_v55 = vadd.f32 %v996_v51, %v213_v54 }
 0x2f3   :  { %v218_v58 = vsel %vm217_vm8, %v996_v51, %v214_v55  ;;  %v381_v55 = vld [vmem:[%s1394_s0 + $0x6] sm:$0x3] }
 0x2f4   :  { %v223_v61 = vsel %vm220_vm9, %v222_v59, %v218_v58 }
 0x2f5   :  { %v226_v6 = vmul.f32 %v223_v61, %v1213_v28 }
 0x33a   :  { %v229_v60 = vpop.permute.xlu2 %228 }
 0x33b   :  { %v231_v62 = vmul.f32 %v229_v60, %v223_v61 }
 0x33d   :  { %233 = vrot.lane.b32.xlu0 %v231_v62, %s1124_s22 }
 0x35a   :  { %v181_v2 = vpop.f32.mrf.mxu2 }
 0x35b   :  { %v182_v3 = vadd.f32 %v1266_v63, %v181_v2 }
 0x35d   :  { %v186_v4 = vrot.slane %v182_v3, 1  ;;  %189 = vst.msk [vmem:[#allocation2] sm:$0x1] %vm188_vm10, %v182_v3 }
 0x35f   :  { %190 = vst.msk [vmem:[#allocation2 + $0x8] sm:$0x1] %vm188_vm10, %v186_v4 }
 0x362   :  { %v183_v5 = vpop.f32.mrf.mxu2 }
 0x3af   :  { %v234_v7 = vpop.permute.xlu0 %233 }
 0x3b0   :  { %v236_v8 = vadd.f32 %v234_v7, %v226_v6 }
 0x3b2   :  { %997 = vtanh.f32 %v236_v8 }
 0x3b8   :  { %v998_v9 = vpop.eup %997 }
 0x3b9   :  { %239 = vrot.lane.b32.xlu1 %v998_v9, %s1123_s1 }
 0x42b   :  { %v240_v10 = vpop.permute.xlu1 %239 }
 0x42c   :  { %v242_v11 = vmul.f32 %v240_v10, %v223_v61 }
 0x42e   :  { %v243_v12 = vpack.c.bf16 %v242_v11, %v242_v11 }
 0x430   :  { %245 = vrot.lane.b32.xlu2 %v243_v12, %s1124_s22 }
 0x48a   :  { %v246_v13 = vpop.permute.xlu2 %245 }
 0x48b   :  { %942 = vmatmul.msk.bf16.vlgmr.msrb.gmra.mxu2 %vm63_vm0, %v246_v13  ;;  %944 = vmatmul.msk.bf16.vlgmr.msrb.gmra.mxu1 %vm63_vm0, %v246_v13 }
 0x48c   :  { %483 = vmatpush.bf16.msrb.mxu2 %v1189_v0  ;;  %560 = vmatpush.bf16.msrb.mxu1 %v1241_v36 }
 0x490   :  { %484 = vmatpush.bf16.msrb.mxu2 %v1195_v1 }
 0x508   :  { %v296_v15 = vpop.f32.mrf.mxu1 }
 0x509   :  { %v300_v16 = vadd.f32 %v296_v15, %v286_v14 }
 0x50b   :  { %999 = vtanh.f32 %v300_v16  ;;  %v945_v24 = vmul.f32 -1.442695, %v300_v16 }
 0x50d   :  { %1001 = vpow2.f32 %v945_v24 }
 0x50e   :  { %v259_v17 = vpop.f32.mrf.mxu2 }
 0x50f   :  { %v260_v18 = vadd.f32 %v1253_v37, %v259_v17 }
 0x510   :  { %v298_v19 = vpop.f32.mrf.mxu1 }
 0x511   :  { %v1000_v20 = vpop.eup %999  ;;  %v263_v21 = vmax.f32 %v260_v18, 0.0 }
 0x512   :  { %323 = vrot.lane.b32.xlu0 %v1000_v20, %s1123_s1 }
 0x513   :  { %v264_v22 = vpack.c.bf16 %v263_v21, %v263_v21  ;;  %v1002_v25 = vpop.eup %1001 }
 0x514   :  { %v304_v26 = vadd.f32 1.0, %v1002_v25 }
 0x515   :  { %943 = vmatmul.msk.bf16.vlgmr.msrb.gmra.mxu0 %vm168_vm5, %v264_v22 }
 0x516   :  { %v261_v23 = vpop.f32.mrf.mxu2  ;;  %541 = vmatpush.bf16.msrb.mxu0 %v1220_v30  ;;  %1003 = vrcp.f32 %v304_v26  ;;  %v316_v34 = vand.u32 2147483648, %v304_v26  ;;  %vm310_vm12 = vweird.f32 %v304_v26  ;;  %v314_v35 = vand.u32 2147483647, %v304_v26 }
 0x518   :  { %v317_v39 = vor.u32 1.1754944e-38, %v316_v34  ;;  %vm315_vm14 = vcmp.eq.f32.partialorder %v314_v35, 8.507059e+37 }
 0x51a   :  { %542 = vmatpush.bf16.msrb.mxu0 %v1226_v31 }
 0x51c   :  { %v1004_v27 = vpop.eup %1003 }
 0x51d   :  { %v306_v28 = vmul.f32 %v1004_v27, %v304_v26  ;;  %vm311_vm11 = vweird.f32 %v1004_v27 }
 0x51e   :  { %vm312_vm13 = vmor %vm310_vm12, %vm311_vm11 }
 0x51f   :  { %v307_v29 = vsub.f32 1.0, %v306_v28 }
 0x521   :  { %v308_v32 = vmul.f32 %v1004_v27, %v307_v29 }
 0x523   :  { %v309_v33 = vadd.f32 %v1004_v27, %v308_v32 }
 0x525   :  { %v313_v38 = vsel %vm312_vm13, %v1004_v27, %v309_v33 }
 0x526   :  { %v318_v41 = vsel %vm315_vm14, %v317_v39, %v313_v38  ;;  %v476_v38 = vld [vmem:[%s1394_s0 + $0x8] sm:$0x3] }
 0x527   :  { %v321_v47 = vmul.f32 %v318_v41, %v236_v8 }
 0x584   :  { %v324_v40 = vpop.permute.xlu0 %323 }
 0x585   :  { %v326_v42 = vmul.f32 %v324_v40, %v318_v41 }
 0x587   :  { %328 = vrot.lane.b32.xlu1 %v326_v42, %s1124_s22 }
 0x592   :  { %v277_v43 = vpop.f32.mrf.mxu0 }
 0x593   :  { %v278_v44 = vadd.f32 %v1266_v63, %v277_v43 }
 0x595   :  { %v282_v45 = vrot.slane %v278_v44, 1  ;;  %284 = vst.msk [vmem:[#allocation2 + $0x1] sm:$0x1] %vm188_vm10, %v278_v44 }
 0x597   :  { %285 = vst.msk [vmem:[#allocation2 + $0x9] sm:$0x1] %vm188_vm10, %v282_v45 }
 0x59a   :  { %v279_v46 = vpop.f32.mrf.mxu0 }
 0x5f9   :  { %v329_v48 = vpop.permute.xlu1 %328 }
 0x5fa   :  { %v331_v49 = vadd.f32 %v329_v48, %v321_v47 }
 0x5fc   :  { %1005 = vtanh.f32 %v331_v49 }
 0x602   :  { %v1006_v50 = vpop.eup %1005 }
 0x603   :  { %334 = vrot.lane.b32.xlu2 %v1006_v50, %s1123_s1 }
 0x65d   :  { %v335_v51 = vpop.permute.xlu2 %334 }
 0x65e   :  { %v337_v52 = vmul.f32 %v335_v51, %v318_v41 }
 0x660   :  { %v338_v53 = vpack.c.bf16 %v337_v52, %v337_v52 }
 0x662   :  { %340 = vrot.lane.b32.xlu0 %v338_v53, %s1124_s22 }
 0x6d4   :  { %v341_v54 = vpop.permute.xlu0 %340 }
 0x6d5   :  { %946 = vmatmul.msk.bf16.vlgmr.msrb.gmra.mxu3 %vm63_vm0, %v341_v54  ;;  %948 = vmatmul.msk.bf16.vlgmr.msra.gmra.mxu0 %vm63_vm0, %v341_v54 }
 0x6d6   :  { %578 = vmatpush.bf16.msrb.mxu3 %v1189_v0  ;;  %655 = vmatpush.bf16.msra.mxu0 %v1241_v36 }
 0x6da   :  { %579 = vmatpush.bf16.msrb.mxu3 %v1195_v1 }
 0x752   :  { %v391_v56 = vpop.f32.mrf.mxu0 }
 0x753   :  { %v395_v57 = vadd.f32 %v391_v56, %v381_v55 }
 0x755   :  { %1007 = vtanh.f32 %v395_v57  ;;  %v949_v4 = vmul.f32 -1.442695, %v395_v57 }
 0x757   :  { %1009 = vpow2.f32 %v949_v4 }
 0x758   :  { %v354_v58 = vpop.f32.mrf.mxu3 }
 0x759   :  { %v355_v59 = vadd.f32 %v1253_v37, %v354_v58 }
 0x75a   :  { %v393_v60 = vpop.f32.mrf.mxu0 }
 0x75b   :  { %v1008_v61 = vpop.eup %1007  ;;  %v358_v62 = vmax.f32 %v355_v59, 0.0 }
 0x75c   :  { %418 = vrot.lane.b32.xlu1 %v1008_v61, %s1123_s1 }
 0x75d   :  { %v359_v2 = vpack.c.bf16 %v358_v62, %v358_v62  ;;  %v1010_v5 = vpop.eup %1009 }
 0x75e   :  { %v399_v6 = vadd.f32 1.0, %v1010_v5 }
 0x75f   :  { %947 = vmatmul.msk.bf16.vlgmr.msra.gmra.mxu2 %vm168_vm5, %v359_v2 }
 0x760   :  { %v356_v3 = vpop.f32.mrf.mxu3  ;;  %636 = vmatpush.bf16.msra.mxu2 %v1220_v30  ;;  %1011 = vrcp.f32 %v399_v6  ;;  %v411_v12 = vand.u32 2147483648, %v399_v6  ;;  %vm405_vm1 = vweird.f32 %v399_v6  ;;  %v409_v13 = vand.u32 2147483647, %v399_v6 }
 0x762   :  { %v412_v15 = vor.u32 1.1754944e-38, %v411_v12  ;;  %vm410_vm3 = vcmp.eq.f32.partialorder %v409_v13, 8.507059e+37 }
 0x764   :  { %637 = vmatpush.bf16.msra.mxu2 %v1226_v31 }
 0x766   :  { %v1012_v7 = vpop.eup %1011 }
 0x767   :  { %v401_v8 = vmul.f32 %v1012_v7, %v399_v6  ;;  %vm406_vm15 = vweird.f32 %v1012_v7 }
 0x768   :  { %vm407_vm2 = vmor %vm405_vm1, %vm406_vm15 }
 0x769   :  { %v402_v9 = vsub.f32 1.0, %v401_v8 }
 0x76b   :  { %v403_v10 = vmul.f32 %v1012_v7, %v402_v9 }
 0x76d   :  { %v404_v11 = vadd.f32 %v1012_v7, %v403_v10 }
 0x76f   :  { %v408_v14 = vsel %vm407_vm2, %v1012_v7, %v404_v11 }
 0x770   :  { %v413_v17 = vsel %vm410_vm3, %v412_v15, %v408_v14  ;;  %v571_v14 = vld [vmem:[%s1394_s0 + $0xa] sm:$0x3] }
 0x771   :  { %v416_v23 = vmul.f32 %v413_v17, %v331_v49 }
 0x7ce   :  { %v419_v16 = vpop.permute.xlu1 %418 }
 0x7cf   :  { %v421_v18 = vmul.f32 %v419_v16, %v413_v17 }
 0x7d1   :  { %423 = vrot.lane.b32.xlu2 %v421_v18, %s1124_s22 }
 0x7e2   :  { %v372_v19 = vpop.f32.mrf.mxu2 }
 0x7e3   :  { %v373_v20 = vadd.f32 %v1266_v63, %v372_v19 }
 0x7e5   :  { %v377_v21 = vrot.slane %v373_v20, 1  ;;  %379 = vst.msk [vmem:[#allocation2 + $0x2] sm:$0x1] %vm188_vm10, %v373_v20 }
 0x7e7   :  { %380 = vst.msk [vmem:[#allocation2 + $0xa] sm:$0x1] %vm188_vm10, %v377_v21 }
 0x7ea   :  { %v374_v22 = vpop.f32.mrf.mxu2 }
 0x82b   :  { %v424_v24 = vpop.permute.xlu2 %423 }
 0x82c   :  { %v426_v25 = vadd.f32 %v424_v24, %v416_v23 }
 0x82e   :  { %1013 = vtanh.f32 %v426_v25 }
 0x834   :  { %v1014_v26 = vpop.eup %1013 }
 0x835   :  { %429 = vrot.lane.b32.xlu0 %v1014_v26, %s1123_s1 }
 0x8a7   :  { %v430_v27 = vpop.permute.xlu0 %429 }
 0x8a8   :  { %v432_v28 = vmul.f32 %v430_v27, %v413_v17 }
 0x8aa   :  { %v433_v29 = vpack.c.bf16 %v432_v28, %v432_v28 }
 0x8ac   :  { %435 = vrot.lane.b32.xlu1 %v433_v29, %s1124_s22 }
 0x91e   :  { %v436_v32 = vpop.permute.xlu1 %435 }
 0x91f   :  { %950 = vmatmul.msk.bf16.vlgmr.msra.gmra.mxu1 %vm63_vm0, %v436_v32  ;;  %952 = vmatmul.msk.bf16.vlgmr.msrb.gmra.mxu2 %vm63_vm0, %v436_v32 }
 0x920   :  { %673 = vmatpush.bf16.msra.mxu1 %v1189_v0  ;;  %750 = vmatpush.bf16.msrb.mxu2 %v1241_v36 }
 0x924   :  { %674 = vmatpush.bf16.msra.mxu1 %v1195_v1 }
 0x99c   :  { %v449_v33 = vpop.f32.mrf.mxu1 }
 0x99d   :  { %v450_v34 = vadd.f32 %v1253_v37, %v449_v33 }
 0x99f   :  { %v453_v35 = vmax.f32 %v450_v34, 0.0 }
 0x9a1   :  { %v454_v39 = vpack.c.bf16 %v453_v35, %v453_v35 }
 0x9a2   :  { %v486_v40 = vpop.f32.mrf.mxu2 }
 0x9a3   :  { %v490_v41 = vadd.f32 %v486_v40, %v476_v38  ;;  %951 = vmatmul.msk.bf16.vlgmr.msra.gmra.mxu3 %vm168_vm5, %v454_v39 }
 0x9a4   :  { %v451_v42 = vpop.f32.mrf.mxu1  ;;  %731 = vmatpush.bf16.msra.mxu3 %v1220_v30 }
 0x9a5   :  { %1015 = vtanh.f32 %v490_v41  ;;  %v953_v45 = vmul.f32 -1.442695, %v490_v41 }
 0x9a7   :  { %1017 = vpow2.f32 %v953_v45 }
 0x9a8   :  { %732 = vmatpush.bf16.msra.mxu3 %v1226_v31 }
 0x9aa   :  { %v488_v43 = vpop.f32.mrf.mxu2 }
 0x9ab   :  { %v1016_v44 = vpop.eup %1015 }
 0x9ac   :  { %513 = vrot.lane.b32.xlu2 %v1016_v44, %s1123_s1 }
 0x9ad   :  { %v1018_v46 = vpop.eup %1017 }
 0x9ae   :  { %v494_v47 = vadd.f32 1.0, %v1018_v46 }
 0x9b0   :  { %1019 = vrcp.f32 %v494_v47  ;;  %v506_v53 = vand.u32 2147483648, %v494_v47  ;;  %vm500_vm6 = vweird.f32 %v494_v47  ;;  %v504_v54 = vand.u32 2147483647, %v494_v47 }
 0x9b2   :  { %v507_v56 = vor.u32 1.1754944e-38, %v506_v53  ;;  %vm505_vm8 = vcmp.eq.f32.partialorder %v504_v54, 8.507059e+37 }
 0x9b6   :  { %v1020_v48 = vpop.eup %1019 }
 0x9b7   :  { %v496_v49 = vmul.f32 %v1020_v48, %v494_v47  ;;  %vm501_vm4 = vweird.f32 %v1020_v48  ;;  %v666_v47 = vld [vmem:[%s1394_s0 + $0xc] sm:$0x3] }
 0x9b8   :  { %vm502_vm7 = vmor %vm500_vm6, %vm501_vm4 }
 0x9b9   :  { %v497_v50 = vsub.f32 1.0, %v496_v49 }
 0x9bb   :  { %v498_v51 = vmul.f32 %v1020_v48, %v497_v50 }
 0x9bd   :  { %v499_v52 = vadd.f32 %v1020_v48, %v498_v51 }
 0x9bf   :  { %v503_v55 = vsel %vm502_vm7, %v1020_v48, %v499_v52 }
 0x9c0   :  { %v508_v58 = vsel %vm505_vm8, %v507_v56, %v503_v55  ;;  %vm860_vm8 = vcmask 254976  }
 0x9c1   :  { %v511_v3 = vmul.f32 %v508_v58, %v426_v25 }
 0xa06   :  { %v514_v57 = vpop.permute.xlu2 %513 }
 0xa07   :  { %v516_v59 = vmul.f32 %v514_v57, %v508_v58 }
 0xa09   :  { %518 = vrot.lane.b32.xlu0 %v516_v59, %s1124_s22 }
 0xa26   :  { %v467_v60 = vpop.f32.mrf.mxu3 }
 0xa27   :  { %v468_v61 = vadd.f32 %v1266_v63, %v467_v60 }
 0xa29   :  { %v472_v62 = vrot.slane %v468_v61, 1  ;;  %474 = vst.msk [vmem:[#allocation2 + $0x3] sm:$0x1] %vm188_vm10, %v468_v61 }
 0xa2b   :  { %475 = vst.msk [vmem:[#allocation2 + $0xb] sm:$0x1] %vm188_vm10, %v472_v62 }
 0xa2e   :  { %v469_v2 = vpop.f32.mrf.mxu3 }
 0xa7b   :  { %v519_v4 = vpop.permute.xlu0 %518 }
 0xa7c   :  { %v521_v5 = vadd.f32 %v519_v4, %v511_v3 }
 0xa7e   :  { %1021 = vtanh.f32 %v521_v5 }
 0xa84   :  { %v1022_v6 = vpop.eup %1021 }
 0xa85   :  { %524 = vrot.lane.b32.xlu1 %v1022_v6, %s1123_s1 }
 0xaf7   :  { %v525_v7 = vpop.permute.xlu1 %524 }
 0xaf8   :  { %v527_v8 = vmul.f32 %v525_v7, %v508_v58 }
 0xafa   :  { %v528_v9 = vpack.c.bf16 %v527_v8, %v527_v8 }
 0xafc   :  { %530 = vrot.lane.b32.xlu2 %v528_v9, %s1124_s22 }
 0xb56   :  { %v531_v10 = vpop.permute.xlu2 %530 }
 0xb57   :  { %954 = vmatmul.msk.bf16.vlgmr.msrb.gmra.mxu0 %vm63_vm0, %v531_v10  ;;  %956 = vmatmul.msk.bf16.vlgmr.msrb.gmra.mxu3 %vm63_vm0, %v531_v10 }
 0xb58   :  { %768 = vmatpush.bf16.msrb.mxu0 %v1189_v0  ;;  %845 = vmatpush.bf16.msrb.mxu3 %v1241_v36 }
 0xb5c   :  { %769 = vmatpush.bf16.msrb.mxu0 %v1195_v1 }
 0xbd4   :  { %v544_v11 = vpop.f32.mrf.mxu0 }
 0xbd5   :  { %v545_v12 = vadd.f32 %v1253_v37, %v544_v11 }
 0xbd7   :  { %v548_v13 = vmax.f32 %v545_v12, 0.0 }
 0xbd9   :  { %v549_v15 = vpack.c.bf16 %v548_v13, %v548_v13 }
 0xbda   :  { %v581_v16 = vpop.f32.mrf.mxu3 }
 0xbdb   :  { %v585_v17 = vadd.f32 %v581_v16, %v571_v14  ;;  %955 = vmatmul.msk.bf16.vlgmr.msrb.gmra.mxu1 %vm168_vm5, %v549_v15 }
 0xbdc   :  { %v546_v18 = vpop.f32.mrf.mxu0  ;;  %826 = vmatpush.bf16.msrb.mxu1 %v1220_v30 }
 0xbdd   :  { %1023 = vtanh.f32 %v585_v17  ;;  %v957_v36 = vmul.f32 -1.442695, %v585_v17 }
 0xbdf   :  { %1025 = vpow2.f32 %v957_v36 }
 0xbe0   :  { %827 = vmatpush.bf16.msrb.mxu1 %v1226_v31 }
 0xbe2   :  { %v583_v0 = vpop.f32.mrf.mxu3 }
 0xbe3   :  { %v1024_v1 = vpop.eup %1023 }
 0xbe4   :  { %608 = vrot.lane.b32.xlu0 %v1024_v1, %s1123_s1 }
 0xbe5   :  { %v1026_v19 = vpop.eup %1025 }
 0xbe6   :  { %v589_v20 = vadd.f32 1.0, %v1026_v19 }
 0xbe8   :  { %1027 = vrcp.f32 %v589_v20  ;;  %v601_v26 = vand.u32 2147483648, %v589_v20  ;;  %vm595_vm11 = vweird.f32 %v589_v20  ;;  %v599_v30 = vand.u32 2147483647, %v589_v20 }
 0xbea   :  { %v602_v27 = vor.u32 1.1754944e-38, %v601_v26  ;;  %vm600_vm13 = vcmp.eq.f32.partialorder %v599_v30, 8.507059e+37 }
 0xbee   :  { %v1028_v21 = vpop.eup %1027 }
 0xbef   :  { %v591_v22 = vmul.f32 %v1028_v21, %v589_v20  ;;  %vm596_vm9 = vweird.f32 %v1028_v21  ;;  %v761_v20 = vld [vmem:[%s1394_s0 + $0xe] sm:$0x3]  ;;  %s1125_s0 = smov 96  }
 0xbf0   :  { %vm597_vm12 = vmor %vm595_vm11, %vm596_vm9 }
 0xbf1   :  { %v592_v23 = vsub.f32 1.0, %v591_v22 }
 0xbf3   :  { %v593_v24 = vmul.f32 %v1028_v21, %v592_v23 }
 0xbf5   :  { %v594_v25 = vadd.f32 %v1028_v21, %v593_v24 }
 0xbf7   :  { %v598_v31 = vsel %vm597_vm12, %v1028_v21, %v594_v25 }
 0xbf8   :  { %v603_v29 = vsel %vm600_vm13, %v602_v27, %v598_v31 }
 0xbf9   :  { %v606_v39 = vmul.f32 %v603_v29, %v521_v5 }
 0xc56   :  { %v609_v28 = vpop.permute.xlu0 %608 }
 0xc57   :  { %v611_v32 = vmul.f32 %v609_v28, %v603_v29 }
 0xc58   :  { %v562_v33 = vpop.f32.mrf.mxu1 }
 0xc59   :  { %v563_v34 = vadd.f32 %v1266_v63, %v562_v33  ;;  %613 = vrot.lane.b32.xlu1 %v611_v32, %s1124_s22 }
 0xc5b   :  { %v567_v35 = vrot.slane %v563_v34, 1  ;;  %569 = vst.msk [vmem:[#allocation2 + $0x4] sm:$0x1] %vm188_vm10, %v563_v34 }
 0xc5d   :  { %570 = vst.msk [vmem:[#allocation2 + $0xc] sm:$0x1] %vm188_vm10, %v567_v35 }
 0xc60   :  { %v564_v38 = vpop.f32.mrf.mxu1 }
 0xccb   :  { %v614_v40 = vpop.permute.xlu1 %613 }
 0xccc   :  { %v616_v41 = vadd.f32 %v614_v40, %v606_v39 }
 0xcce   :  { %1029 = vtanh.f32 %v616_v41 }
 0xcd4   :  { %v1030_v42 = vpop.eup %1029 }
 0xcd5   :  { %619 = vrot.lane.b32.xlu2 %v1030_v42, %s1123_s1 }
 0xd2f   :  { %v620_v43 = vpop.permute.xlu2 %619 }
 0xd30   :  { %v622_v44 = vmul.f32 %v620_v43, %v603_v29 }
 0xd32   :  { %v623_v45 = vpack.c.bf16 %v622_v44, %v622_v44 }
 0xd34   :  { %625 = vrot.lane.b32.xlu0 %v623_v45, %s1124_s22 }
 0xda6   :  { %v626_v46 = vpop.permute.xlu0 %625 }
 0xda7   :  { %958 = vmatmul.msk.bf16.vlgmr.msra.gmra.mxu2 %vm63_vm0, %v626_v46  ;;  %960 = vmatmul.msk.bf16.vlgmr.msra.gmra.mxu1 %vm63_vm0, %v626_v46 }
 0xe24   :  { %v676_v48 = vpop.f32.mrf.mxu1 }
 0xe25   :  { %v680_v49 = vadd.f32 %v676_v48, %v666_v47 }
 0xe27   :  { %1031 = vtanh.f32 %v680_v49  ;;  %v961_v57 = vmul.f32 -1.442695, %v680_v49 }
 0xe29   :  { %1033 = vpow2.f32 %v961_v57 }
 0xe2a   :  { %v639_v50 = vpop.f32.mrf.mxu2 }
 0xe2b   :  { %v640_v51 = vadd.f32 %v1253_v37, %v639_v50 }
 0xe2c   :  { %v678_v52 = vpop.f32.mrf.mxu1 }
 0xe2d   :  { %v1032_v53 = vpop.eup %1031  ;;  %v643_v54 = vmax.f32 %v640_v51, 0.0 }
 0xe2e   :  { %703 = vrot.lane.b32.xlu1 %v1032_v53, %s1123_s1 }
 0xe2f   :  { %v644_v55 = vpack.c.bf16 %v643_v54, %v643_v54  ;;  %v1034_v58 = vpop.eup %1033 }
 0xe30   :  { %v684_v59 = vadd.f32 1.0, %v1034_v58 }
 0xe31   :  { %959 = vmatmul.msk.bf16.vlgmr.msra.gmra.mxu0 %vm168_vm5, %v644_v55 }
 0xe32   :  { %v641_v56 = vpop.f32.mrf.mxu2  ;;  %1035 = vrcp.f32 %v684_v59  ;;  %v696_v4 = vand.u32 2147483648, %v684_v59  ;;  %vm690_vm15 = vweird.f32 %v684_v59  ;;  %v694_v5 = vand.u32 2147483647, %v684_v59 }
 0xe34   :  { %v697_v7 = vor.u32 1.1754944e-38, %v696_v4  ;;  %vm695_vm2 = vcmp.eq.f32.partialorder %v694_v5, 8.507059e+37 }
 0xe38   :  { %v1036_v60 = vpop.eup %1035 }
 0xe39   :  { %v686_v61 = vmul.f32 %v1036_v60, %v684_v59  ;;  %vm691_vm14 = vweird.f32 %v1036_v60 }
 0xe3a   :  { %vm692_vm1 = vmor %vm690_vm15, %vm691_vm14 }
 0xe3b   :  { %v687_v62 = vsub.f32 1.0, %v686_v61 }
 0xe3d   :  { %v688_v2 = vmul.f32 %v1036_v60, %v687_v62 }
 0xe3f   :  { %v689_v3 = vadd.f32 %v1036_v60, %v688_v2 }
 0xe41   :  { %v693_v6 = vsel %vm692_vm1, %v1036_v60, %v689_v3 }
 0xe42   :  { %v698_v9 = vsel %vm695_vm2, %v697_v7, %v693_v6 }
 0xe43   :  { %v701_v15 = vmul.f32 %v698_v9, %v616_v41 }
 0xea0   :  { %v704_v8 = vpop.permute.xlu1 %703 }
 0xea1   :  { %v706_v10 = vmul.f32 %v704_v8, %v698_v9 }
 0xea3   :  { %708 = vrot.lane.b32.xlu2 %v706_v10, %s1124_s22 }
 0xeae   :  { %v657_v11 = vpop.f32.mrf.mxu0 }
 0xeaf   :  { %v658_v12 = vadd.f32 %v1266_v63, %v657_v11 }
 0xeb1   :  { %v662_v13 = vrot.slane %v658_v12, 1  ;;  %664 = vst.msk [vmem:[#allocation2 + $0x5] sm:$0x1] %vm188_vm10, %v658_v12 }
 0xeb3   :  { %665 = vst.msk [vmem:[#allocation2 + $0xd] sm:$0x1] %vm188_vm10, %v662_v13 }
 0xeb6   :  { %v659_v14 = vpop.f32.mrf.mxu0 }
 0xefd   :  { %v709_v16 = vpop.permute.xlu2 %708 }
 0xefe   :  { %v711_v17 = vadd.f32 %v709_v16, %v701_v15 }
 0xf00   :  { %1037 = vtanh.f32 %v711_v17 }
 0xf06   :  { %v1038_v18 = vpop.eup %1037 }
 0xf07   :  { %714 = vrot.lane.b32.xlu0 %v1038_v18, %s1123_s1 }
 0xf79   :  { %v715_v0 = vpop.permute.xlu0 %714 }
 0xf7a   :  { %v717_v1 = vmul.f32 %v715_v0, %v698_v9 }
 0xf7c   :  { %v718_v36 = vpack.c.bf16 %v717_v1, %v717_v1 }
 0xf7e   :  { %720 = vrot.lane.b32.xlu1 %v718_v36, %s1124_s22 }
 0xff0   :  { %v721_v19 = vpop.permute.xlu1 %720 }
 0xff1   :  { %962 = vmatmul.msk.bf16.vlgmr.msra.gmra.mxu3 %vm63_vm0, %v721_v19  ;;  %964 = vmatmul.msk.bf16.vlgmr.msrb.gmra.mxu0 %vm63_vm0, %v721_v19 }
0x106e   :  { %v771_v21 = vpop.f32.mrf.mxu0 }
0x106f   :  { %v775_v22 = vadd.f32 %v771_v21, %v761_v20 }
0x1071   :  { %1039 = vtanh.f32 %v775_v22  ;;  %v965_v28 = vmul.f32 -1.442695, %v775_v22 }
0x1073   :  { %1041 = vpow2.f32 %v965_v28 }
0x1074   :  { %v734_v23 = vpop.f32.mrf.mxu3 }
0x1075   :  { %v735_v24 = vadd.f32 %v1253_v37, %v734_v23 }
0x1076   :  { %v773_v25 = vpop.f32.mrf.mxu0 }
0x1077   :  { %v1040_v26 = vpop.eup %1039  ;;  %v738_v30 = vmax.f32 %v735_v24, 0.0 }
0x1078   :  { %798 = vrot.lane.b32.xlu2 %v1040_v26, %s1123_s1 }
0x1079   :  { %v739_v31 = vpack.c.bf16 %v738_v30, %v738_v30  ;;  %v1042_v29 = vpop.eup %1041 }
0x107a   :  { %v779_v32 = vadd.f32 1.0, %v1042_v29 }
0x107b   :  { %963 = vmatmul.msk.bf16.vlgmr.msrb.gmra.mxu2 %vm168_vm5, %v739_v31 }
0x107c   :  { %v736_v27 = vpop.f32.mrf.mxu3  ;;  %1043 = vrcp.f32 %v779_v32  ;;  %v791_v40 = vand.u32 2147483648, %v779_v32  ;;  %vm785_vm4 = vweird.f32 %v779_v32  ;;  %v789_v41 = vand.u32 2147483647, %v779_v32 }
0x107e   :  { %v792_v43 = vor.u32 1.1754944e-38, %v791_v40  ;;  %vm790_vm7 = vcmp.eq.f32.partialorder %v789_v41, 8.507059e+37 }
0x1082   :  { %v1044_v33 = vpop.eup %1043 }
0x1083   :  { %v781_v34 = vmul.f32 %v1044_v33, %v779_v32  ;;  %vm786_vm3 = vweird.f32 %v1044_v33 }
0x1084   :  { %vm787_vm6 = vmor %vm785_vm4, %vm786_vm3 }
0x1085   :  { %v782_v35 = vsub.f32 1.0, %v781_v34 }
0x1087   :  { %v783_v38 = vmul.f32 %v1044_v33, %v782_v35 }
0x1089   :  { %v784_v39 = vadd.f32 %v1044_v33, %v783_v38 }
0x108b   :  { %v788_v42 = vsel %vm787_vm6, %v1044_v33, %v784_v39 }
0x108c   :  { %v793_v45 = vsel %vm790_vm7, %v792_v43, %v788_v42 }
0x108d   :  { %v796_v51 = vmul.f32 %v793_v45, %v711_v17 }
0x10d2   :  { %v799_v44 = vpop.permute.xlu2 %798 }
0x10d3   :  { %v801_v46 = vmul.f32 %v799_v44, %v793_v45 }
0x10d5   :  { %803 = vrot.lane.b32.xlu0 %v801_v46, %s1124_s22 }
0x10fe   :  { %v752_v47 = vpop.f32.mrf.mxu2 }
0x10ff   :  { %v753_v48 = vadd.f32 %v1266_v63, %v752_v47 }
0x1101   :  { %v757_v49 = vrot.slane %v753_v48, 1  ;;  %759 = vst.msk [vmem:[#allocation2 + $0x6] sm:$0x1] %vm188_vm10, %v753_v48 }
0x1103   :  { %760 = vst.msk [vmem:[#allocation2 + $0xe] sm:$0x1] %vm188_vm10, %v757_v49 }
0x1106   :  { %v754_v50 = vpop.f32.mrf.mxu2 }
0x1147   :  { %v804_v52 = vpop.permute.xlu0 %803 }
0x1148   :  { %v806_v53 = vadd.f32 %v804_v52, %v796_v51 }
0x114a   :  { %1045 = vtanh.f32 %v806_v53 }
0x1150   :  { %v1046_v54 = vpop.eup %1045 }
0x1151   :  { %809 = vrot.lane.b32.xlu1 %v1046_v54, %s1123_s1  ;;  %s1126_s1 = smov [#allocation4]  }
0x1152   :  { %s885_s21 = sshll.u32 %s1126_s1, 4  ;;  %s886_s21 = int_to_ptr.vmem [resolvable:$true] %s885_s21 }
0x1159   :  { %863 = vrot.lane.b32.xlu1 %v806_v53, %s1125_s0 }
0x11c3   :  { %v810_v55 = vpop.permute.xlu1 %809 }
0x11c4   :  { %v812_v56 = vmul.f32 %v810_v55, %v793_v45 }
0x11c6   :  { %v813_v57 = vpack.c.bf16 %v812_v56, %v812_v56  ;;  %857 = vrot.lane.b32.xlu0 %v812_v56, %s1124_s22 }
0x11c8   :  { %815 = vrot.lane.b32.xlu2 %v813_v57, %s1124_s22 }
0x11cb   :  { %v864_v58 = vpop.permute.xlu1 %863 }
0x11cc   :  { %866 = vst.msk [vmem:[#allocation6] sm:$0x3] %vm860_vm8, %v864_v58 }
0x1222   :  { %v816_v59 = vpop.permute.xlu2 %815 }
0x1223   :  { %966 = vmatmul.msk.bf16.vlgmr.msrb.gmra.mxu1 %vm63_vm0, %v816_v59 }
0x1238   :  { %v858_v60 = vpop.permute.xlu0 %857 }
0x1239   :  { %861 = vst.msk [vmem:[#allocation4] sm:$0x3] %vm860_vm8, %v858_v60 }
0x123a   :  { %890 = dma.vmem_to_hbm [thread:$0]  %s886_s21, 32, %s888_s23, [#allocation5]  }
0x123b   :  { %901 = dma.vmem_to_hbm [thread:$0]  %s897_s25, 32, %s899_s27, [#allocation5]  }
0x12a0   :  { %v829_v61 = vpop.f32.mrf.mxu1 }
0x12a1   :  { %v830_v62 = vadd.f32 %v1253_v37, %v829_v61 }
0x12a3   :  { %v833_v2 = vmax.f32 %v830_v62, 0.0 }
0x12a5   :  { %v834_v3 = vpack.c.bf16 %v833_v2, %v833_v2 }
0x12a7   :  { %967 = vmatmul.msk.bf16.vlgmr.msrb.gmra.mxu3 %vm168_vm5, %v834_v3 }
0x12a8   :  { %v831_v4 = vpop.f32.mrf.mxu1 }
0x132a   :  { %v847_v37 = vpop.f32.mrf.mxu3 }
0x132b   :  { %v848_v5 = vadd.f32 %v1266_v63, %v847_v37 }
0x132d   :  { %v852_v6 = vrot.slane %v848_v5, 1  ;;  %854 = vst.msk [vmem:[#allocation2 + $0x7] sm:$0x1] %vm188_vm10, %v848_v5 }
0x132f   :  { %855 = vst.msk [vmem:[#allocation2 + $0xf] sm:$0x1] %vm188_vm10, %v852_v6 }
0x1330   :  { %879 = dma.vmem_to_hbm [thread:$0]  %s872_s6, 256, %s874_s30, [#allocation3], %s1129_s9, %s1129_s9, %s1130_s10  }
0x1332   :  { %v849_v7 = vpop.f32.mrf.mxu3 }
0x1333   :  { %1119 = dma.done.wait [#allocation3], 256  }
0x1334   :  { %1120 = vsyncadd [#allocation3], 4294967040 }
0x1335   :  { %1121 = dma.done.wait [#allocation5], 64  }
0x1336   :  { %1122 = vsyncadd [#allocation5], 4294967232 }
0x1337   :  { %914 = vsyncpa [#allocation3], 1 }
0x1338   :  { %915 = vsyncpa [#allocation5], 1 }

</bundles_post_ra>
